<compile_context>
chip_gen: v5e
topology: v5e:2x2
jax: 0.10.0
libtpu: 0.0.40
codegen_flags: <defaults>
</compile_context>

<pallas_src>
import jax
import jax.numpy as jnp
from jax.experimental import pallas as pl
from jax.experimental.pallas import tpu as pltpu

SIZE_LEN = 28                      # mnist_trainset.data[0].size()[0]
IN_DIM = SIZE_LEN * SIZE_LEN       # 784
NEG_INF = -1e30                    # mask value for padded class columns


def _round_up(x, m):
    return ((x + m - 1) // m) * m


# ----------------------------------------------------------------------------- kernel
def mlp_kernel(x_ref, w1, b1, w2, b2, w3, b3, w4, b4, w5, b5, o_ref):
    """One batch tile: 5 matmuls (bf16 MXU, f32 accum) + ReLU + log-softmax."""
    # x arrives f32 straight from the caller; cast to bf16 in VMEM (VPU, free on
    # this mem-bound kernel) so all matmuls use the MXU bf16 path.
    x = x_ref[...].astype(jnp.bfloat16)                                   # (TB, 784)

    h = jnp.dot(x, w1[...], preferred_element_type=jnp.float32) + b1[...]
    h = jnp.maximum(h, 0.0).astype(jnp.bfloat16)                          # fc1 + ReLU
    h = jnp.dot(h, w2[...], preferred_element_type=jnp.float32) + b2[...]
    h = jnp.maximum(h, 0.0).astype(jnp.bfloat16)                          # fc2 + ReLU
    h = jnp.dot(h, w3[...], preferred_element_type=jnp.float32) + b3[...]
    h = jnp.maximum(h, 0.0).astype(jnp.bfloat16)                          # fc3 + ReLU
    h = jnp.dot(h, w4[...], preferred_element_type=jnp.float32) + b4[...]
    h = jnp.maximum(h, 0.0).astype(jnp.bfloat16)                          # fc4 + ReLU
    logits = jnp.dot(h, w5[...], preferred_element_type=jnp.float32) + b5[...]  # fc5

    # Padded class columns carry a -1e30 bias -> exp() underflows to 0, so the
    # log-softmax over the real C classes is exactly the unpadded result.
    m = jnp.max(logits, axis=-1, keepdims=True)
    shifted = logits - m
    lse = jnp.log(jnp.sum(jnp.exp(shifted), axis=-1, keepdims=True))
    o_ref[...] = (shifted - lse).astype(o_ref.dtype)                      # (TB, Cp) bf16


# ----------------------------------------------------------------------------- params
def init_params(key, H, C):
    """Deterministic torch.nn.Linear-style init. Weights stored as (in, out) == W.T."""
    dims = [(IN_DIM, H), (H, H), (H, H), (H, H), (H, C)]
    params = []
    for i, (fan_in, fan_out) in enumerate(dims):
        kw, kb = jax.random.split(jax.random.fold_in(key, i))
        bound = 1.0 / jnp.sqrt(fan_in)
        w = jax.random.uniform(kw, (fan_in, fan_out), jnp.float32, -bound, bound)
        b = jax.random.uniform(kb, (1, fan_out), jnp.float32, -bound, bound)
        params.append((w, b))
    return params


def _pad_params(params, h_pad, c_pad):
    """Zero-pad hidden/class dims to lane-aligned widths; weights -> bf16, biases f32.

    K (=784) is intentionally left unpadded: w1's block is the full array, so the
    lane constraint does not apply and Mosaic pads it in VMEM only.
    """
    (w1, b1), (w2, b2), (w3, b3), (w4, b4), (w5, b5) = params

    def pad_w(w, rows, cols):
        out = jnp.zeros((rows, cols), jnp.float32)
        out = out.at[: w.shape[0], : w.shape[1]].set(w.astype(jnp.float32))
        return out.astype(jnp.bfloat16)

    def pad_b(b, cols, fill=0.0):
        out = jnp.full((1, cols), fill, jnp.float32)
        return out.at[:, : b.shape[1]].set(b.reshape(1, -1).astype(jnp.float32))

    return (
        (pad_w(w1, IN_DIM, h_pad), pad_b(b1, h_pad)),
        (pad_w(w2, h_pad, h_pad), pad_b(b2, h_pad)),
        (pad_w(w3, h_pad, h_pad), pad_b(b3, h_pad)),
        (pad_w(w4, h_pad, h_pad), pad_b(b4, h_pad)),
        (pad_w(w5, h_pad, c_pad), pad_b(b5, c_pad, fill=NEG_INF)),
    )


# ----------------------------------------------------------------------------- wrapper
def mlp_forward(x, params, *, tb=1024):
    """x: (B, 1, 28, 28) or (B, 28, 28) float32. Returns (B, C) log-probs (f32)."""
    B = x.shape[0]
    x2d = x.reshape(B, -1).astype(jnp.float32)            # == torch x.view(-1, 784); no copy
    K = x2d.shape[1]
    H = params[0][0].shape[1]
    C = params[-1][0].shape[1]

    h_pad = _round_up(max(H, 128), 128)                   # 32 -> 128
    c_pad = _round_up(max(C, 128), 128)                   # 10 -> 128

    # Batch tile: large (amortizes ~0.35us/step overhead), multiple of 16 (bf16
    # sublane packing of intermediates), capped so the grid has >=2 steps when
    # B > TB (both v7x TensorCores busy) and never larger than needed for small B.
    TB = min(_round_up(tb, 16),
             _round_up(pl.cdiv(B, 2), 16),
             _round_up(B, 8))
    grid = (pl.cdiv(B, TB),)                              # edge block is clipped by Pallas

    pw = _pad_params(params, h_pad, c_pad)
    (w1, b1), (w2, b2), (w3, b3), (w4, b4), (w5, b5) = pw

    # x block: (TB, 784) f32 -- last dim equals the full array dim, TB % 8 == 0.
    x_spec = pl.BlockSpec((TB, K), lambda i: (i, 0))
    out_spec = pl.BlockSpec((TB, c_pad), lambda i: (i, 0))

    def resident(arr):
        # Full array as one block, same block every step -> stays VMEM-resident.
        return pl.BlockSpec(arr.shape, lambda i: (0, 0))

    in_specs = [x_spec,
                resident(w1), resident(b1),
                resident(w2), resident(b2),
                resident(w3), resident(b3),
                resident(w4), resident(b4),
                resident(w5), resident(b5)]

    flops = 2 * B * (K * h_pad + 3 * h_pad * h_pad + h_pad * c_pad)
    bytes_accessed = (B * K * 4                            # f32 input stream
                      + B * c_pad * 2                      # bf16 output
                      + sum(int(w.size) * 2 + int(b.size) * 4 for (w, b) in pw))
    cost = pl.CostEstimate(flops=flops,
                           transcendentals=B * c_pad,
                           bytes_accessed=bytes_accessed)

    out = pl.pallas_call(
        mlp_kernel,
        out_shape=jax.ShapeDtypeStruct((B, c_pad), jnp.bfloat16),
        grid=grid,
        in_specs=in_specs,
        out_specs=out_spec,
        compiler_params=pltpu.CompilerParams(dimension_semantics=("parallel",)),
        cost_estimate=cost,
    )(x2d, w1, b1, w2, b2, w3, b3, w4, b4, w5, b5)

    # Slice off padded classes; hand back f32 (tiny (B, C) cast) to match torch.
    return out[:, :C].astype(jnp.float32)


def mlp_reference(x, params):
    """Pure-jnp f32 reference matching the torch forward."""
    B = x.shape[0]
    h = x.reshape(B, -1).astype(jnp.float32)
    n = len(params)
    for i, (w, b) in enumerate(params):
        h = h @ w + b
        if i < n - 1:
            h = jnp.maximum(h, 0.0)
    return jax.nn.log_softmax(h, axis=-1)


if __name__ == "__main__":
    key = jax.random.PRNGKey(0)
    H, C, B = 32, 10, 8

    k_x, k_p = jax.random.split(key)
    x = jax.random.normal(k_x, (B, 1, SIZE_LEN, SIZE_LEN), jnp.float32)
    params = init_params(k_p, H, C)

    out = mlp_forward(x, params)
    jax.block_until_ready(out)

    assert out.shape == (B, C)
    # Each row of log-softmax output should exp-sum to ~1 (bf16 output -> loose tol).
    row_sums = jnp.sum(jnp.exp(out), axis=1)
    assert jnp.allclose(row_sums, jnp.ones((B,)), atol=2e-2), row_sums
    # Match the pure-f32 reference (bf16 x/weights/output -> small drift allowed).
    ref = mlp_reference(x, params)
    assert jnp.allclose(out, ref, atol=1e-1, rtol=5e-2), float(jnp.max(jnp.abs(out - ref)))

    print("KERNEL_OK")
</pallas_src>

<mosaic_0001>
module attributes {stable_mosaic.version = 11 : i64} {
  func.func @mlp_kernel(%arg0: i32, %arg1: memref<8x784xf32, #tpu.memory_space<vmem>>, %arg2: memref<784x128xbf16, #tpu.memory_space<vmem>>, %arg3: memref<1x128xf32, #tpu.memory_space<vmem>>, %arg4: memref<128x128xbf16, #tpu.memory_space<vmem>>, %arg5: memref<1x128xf32, #tpu.memory_space<vmem>>, %arg6: memref<128x128xbf16, #tpu.memory_space<vmem>>, %arg7: memref<1x128xf32, #tpu.memory_space<vmem>>, %arg8: memref<128x128xbf16, #tpu.memory_space<vmem>>, %arg9: memref<1x128xf32, #tpu.memory_space<vmem>>, %arg10: memref<128x128xbf16, #tpu.memory_space<vmem>>, %arg11: memref<1x128xf32, #tpu.memory_space<vmem>>, %arg12: memref<8x128xbf16, #tpu.memory_space<vmem>>) attributes {dimension_semantics = [#tpu.dimension_semantics<parallel>], iteration_bounds = array<i64: 1>, scalar_prefetch = 0 : i64, scratch_operands = 0 : i64, tpu.core_type = #tpu.core_type<tc>, window_params = [{transform_indices = @transform_0, window_bounds = array<i64: 8, 784>}, {pipeline_mode = #tpu.pipeline_mode<synchronous>, transform_indices = @transform_1, window_bounds = array<i64: 784, 128>}, {pipeline_mode = #tpu.pipeline_mode<synchronous>, transform_indices = @transform_2, window_bounds = array<i64: 1, 128>}, {pipeline_mode = #tpu.pipeline_mode<synchronous>, transform_indices = @transform_3, window_bounds = array<i64: 128, 128>}, {pipeline_mode = #tpu.pipeline_mode<synchronous>, transform_indices = @transform_4, window_bounds = array<i64: 1, 128>}, {pipeline_mode = #tpu.pipeline_mode<synchronous>, transform_indices = @transform_5, window_bounds = array<i64: 128, 128>}, {pipeline_mode = #tpu.pipeline_mode<synchronous>, transform_indices = @transform_6, window_bounds = array<i64: 1, 128>}, {pipeline_mode = #tpu.pipeline_mode<synchronous>, transform_indices = @transform_7, window_bounds = array<i64: 128, 128>}, {pipeline_mode = #tpu.pipeline_mode<synchronous>, transform_indices = @transform_8, window_bounds = array<i64: 1, 128>}, {pipeline_mode = #tpu.pipeline_mode<synchronous>, transform_indices = @transform_9, window_bounds = array<i64: 128, 128>}, {pipeline_mode = #tpu.pipeline_mode<synchronous>, transform_indices = @transform_10, window_bounds = array<i64: 1, 128>}, {transform_indices = @transform_11, window_bounds = array<i64: 8, 128>}]} {
    %c0 = arith.constant 0 : index
    %c0_0 = arith.constant 0 : index
    %0 = vector.load %arg1[%c0, %c0_0] : memref<8x784xf32, #tpu.memory_space<vmem>>, vector<8x784xf32>
    %1 = arith.truncf %0 : vector<8x784xf32> to vector<8x784xbf16>
    %c0_1 = arith.constant 0 : index
    %c0_2 = arith.constant 0 : index
    %2 = vector.load %arg2[%c0_1, %c0_2] : memref<784x128xbf16, #tpu.memory_space<vmem>>, vector<784x128xbf16>
    %cst = arith.constant dense<0.000000e+00> : vector<8x128xf32>
    %3 = tpu.matmul %1, %2, %cst {dimension_numbers = #tpu.dot_dimension_numbers<[1], [0], [0], [1], [0, 0, 1, 1], [], []>} : vector<8x784xbf16>, vector<784x128xbf16>, vector<8x128xf32> -> vector<8x128xf32>
    %c0_3 = arith.constant 0 : index
    %c0_4 = arith.constant 0 : index
    %4 = vector.load %arg3[%c0_3, %c0_4] : memref<1x128xf32, #tpu.memory_space<vmem>>, vector<1x128xf32>
    %5 = vector.broadcast %4 : vector<1x128xf32> to vector<8x128xf32>
    %6 = arith.addf %3, %5 : vector<8x128xf32>
    %cst_5 = arith.constant 0.000000e+00 : f32
    %7 = vector.broadcast %cst_5 : f32 to vector<8x128xf32>
    %8 = arith.maximumf %6, %7 : vector<8x128xf32>
    %9 = arith.truncf %8 : vector<8x128xf32> to vector<8x128xbf16>
    %c0_6 = arith.constant 0 : index
    %c0_7 = arith.constant 0 : index
    %10 = vector.load %arg4[%c0_6, %c0_7] : memref<128x128xbf16, #tpu.memory_space<vmem>>, vector<128x128xbf16>
    %cst_8 = arith.constant dense<0.000000e+00> : vector<8x128xf32>
    %11 = tpu.matmul %9, %10, %cst_8 {dimension_numbers = #tpu.dot_dimension_numbers<[1], [0], [0], [1], [0, 0, 1, 1], [], []>} : vector<8x128xbf16>, vector<128x128xbf16>, vector<8x128xf32> -> vector<8x128xf32>
    %c0_9 = arith.constant 0 : index
    %c0_10 = arith.constant 0 : index
    %12 = vector.load %arg5[%c0_9, %c0_10] : memref<1x128xf32, #tpu.memory_space<vmem>>, vector<1x128xf32>
    %13 = vector.broadcast %12 : vector<1x128xf32> to vector<8x128xf32>
    %14 = arith.addf %11, %13 : vector<8x128xf32>
    %cst_11 = arith.constant 0.000000e+00 : f32
    %15 = vector.broadcast %cst_11 : f32 to vector<8x128xf32>
    %16 = arith.maximumf %14, %15 : vector<8x128xf32>
    %17 = arith.truncf %16 : vector<8x128xf32> to vector<8x128xbf16>
    %c0_12 = arith.constant 0 : index
    %c0_13 = arith.constant 0 : index
    %18 = vector.load %arg6[%c0_12, %c0_13] : memref<128x128xbf16, #tpu.memory_space<vmem>>, vector<128x128xbf16>
    %cst_14 = arith.constant dense<0.000000e+00> : vector<8x128xf32>
    %19 = tpu.matmul %17, %18, %cst_14 {dimension_numbers = #tpu.dot_dimension_numbers<[1], [0], [0], [1], [0, 0, 1, 1], [], []>} : vector<8x128xbf16>, vector<128x128xbf16>, vector<8x128xf32> -> vector<8x128xf32>
    %c0_15 = arith.constant 0 : index
    %c0_16 = arith.constant 0 : index
    %20 = vector.load %arg7[%c0_15, %c0_16] : memref<1x128xf32, #tpu.memory_space<vmem>>, vector<1x128xf32>
    %21 = vector.broadcast %20 : vector<1x128xf32> to vector<8x128xf32>
    %22 = arith.addf %19, %21 : vector<8x128xf32>
    %cst_17 = arith.constant 0.000000e+00 : f32
    %23 = vector.broadcast %cst_17 : f32 to vector<8x128xf32>
    %24 = arith.maximumf %22, %23 : vector<8x128xf32>
    %25 = arith.truncf %24 : vector<8x128xf32> to vector<8x128xbf16>
    %c0_18 = arith.constant 0 : index
    %c0_19 = arith.constant 0 : index
    %26 = vector.load %arg8[%c0_18, %c0_19] : memref<128x128xbf16, #tpu.memory_space<vmem>>, vector<128x128xbf16>
    %cst_20 = arith.constant dense<0.000000e+00> : vector<8x128xf32>
    %27 = tpu.matmul %25, %26, %cst_20 {dimension_numbers = #tpu.dot_dimension_numbers<[1], [0], [0], [1], [0, 0, 1, 1], [], []>} : vector<8x128xbf16>, vector<128x128xbf16>, vector<8x128xf32> -> vector<8x128xf32>
    %c0_21 = arith.constant 0 : index
    %c0_22 = arith.constant 0 : index
    %28 = vector.load %arg9[%c0_21, %c0_22] : memref<1x128xf32, #tpu.memory_space<vmem>>, vector<1x128xf32>
    %29 = vector.broadcast %28 : vector<1x128xf32> to vector<8x128xf32>
    %30 = arith.addf %27, %29 : vector<8x128xf32>
    %cst_23 = arith.constant 0.000000e+00 : f32
    %31 = vector.broadcast %cst_23 : f32 to vector<8x128xf32>
    %32 = arith.maximumf %30, %31 : vector<8x128xf32>
    %33 = arith.truncf %32 : vector<8x128xf32> to vector<8x128xbf16>
    %c0_24 = arith.constant 0 : index
    %c0_25 = arith.constant 0 : index
    %34 = vector.load %arg10[%c0_24, %c0_25] : memref<128x128xbf16, #tpu.memory_space<vmem>>, vector<128x128xbf16>
    %cst_26 = arith.constant dense<0.000000e+00> : vector<8x128xf32>
    %35 = tpu.matmul %33, %34, %cst_26 {dimension_numbers = #tpu.dot_dimension_numbers<[1], [0], [0], [1], [0, 0, 1, 1], [], []>} : vector<8x128xbf16>, vector<128x128xbf16>, vector<8x128xf32> -> vector<8x128xf32>
    %c0_27 = arith.constant 0 : index
    %c0_28 = arith.constant 0 : index
    %36 = vector.load %arg11[%c0_27, %c0_28] : memref<1x128xf32, #tpu.memory_space<vmem>>, vector<1x128xf32>
    %37 = vector.broadcast %36 : vector<1x128xf32> to vector<8x128xf32>
    %38 = arith.addf %35, %37 : vector<8x128xf32>
    %cst_29 = arith.constant dense<0xFF800000> : vector<8xf32>
    %39 = vector.multi_reduction <maximumf>, %38, %cst_29 [1] : vector<8x128xf32> to vector<8xf32>
    %40 = vector.shape_cast %39 : vector<8xf32> to vector<8x1xf32>
    %41 = vector.broadcast %40 : vector<8x1xf32> to vector<8x128xf32>
    %42 = arith.subf %38, %41 : vector<8x128xf32>
    %43 = math.exp %42 : vector<8x128xf32>
    %cst_30 = arith.constant dense<0.000000e+00> : vector<8xf32>
    %44 = vector.multi_reduction <add>, %43, %cst_30 [1] : vector<8x128xf32> to vector<8xf32>
    %45 = vector.shape_cast %44 : vector<8xf32> to vector<8x1xf32>
    %46 = math.log %45 : vector<8x1xf32>
    %47 = vector.broadcast %46 : vector<8x1xf32> to vector<8x128xf32>
    %48 = arith.subf %42, %47 : vector<8x128xf32>
    %49 = arith.truncf %48 : vector<8x128xf32> to vector<8x128xbf16>
    %c0_31 = arith.constant 0 : index
    %c0_32 = arith.constant 0 : index
    %50 = vector.load %arg12[%c0_31, %c0_32] : memref<8x128xbf16, #tpu.memory_space<vmem>>, vector<8x128xbf16>
    tpu.vector_store %arg12[%c0_31, %c0_32], %49 {strides = array<i32>} : memref<8x128xbf16, #tpu.memory_space<vmem>>, vector<8x128xbf16>,
    return
  }
  func.func @transform_0(%arg0: i32) -> (i32, i32) {
    %c0_i32 = arith.constant 0 : i32
    %c0_i32_0 = arith.constant 0 : i32
    return %arg0, %c0_i32 : i32, i32
  }
  func.func @transform_1(%arg0: i32) -> (i32, i32) {
    %c0_i32 = arith.constant 0 : i32
    %c0_i32_0 = arith.constant 0 : i32
    %c0_i32_1 = arith.constant 0 : i32
    return %c0_i32, %c0_i32_0 : i32, i32
  }
  func.func @transform_2(%arg0: i32) -> (i32, i32) {
    %c0_i32 = arith.constant 0 : i32
    %c0_i32_0 = arith.constant 0 : i32
    %c0_i32_1 = arith.constant 0 : i32
    return %c0_i32, %c0_i32_0 : i32, i32
  }
  func.func @transform_3(%arg0: i32) -> (i32, i32) {
    %c0_i32 = arith.constant 0 : i32
    %c0_i32_0 = arith.constant 0 : i32
    %c0_i32_1 = arith.constant 0 : i32
    return %c0_i32, %c0_i32_0 : i32, i32
  }
  func.func @transform_4(%arg0: i32) -> (i32, i32) {
    %c0_i32 = arith.constant 0 : i32
    %c0_i32_0 = arith.constant 0 : i32
    %c0_i32_1 = arith.constant 0 : i32
    return %c0_i32, %c0_i32_0 : i32, i32
  }
  func.func @transform_5(%arg0: i32) -> (i32, i32) {
    %c0_i32 = arith.constant 0 : i32
    %c0_i32_0 = arith.constant 0 : i32
    %c0_i32_1 = arith.constant 0 : i32
    return %c0_i32, %c0_i32_0 : i32, i32
  }
  func.func @transform_6(%arg0: i32) -> (i32, i32) {
    %c0_i32 = arith.constant 0 : i32
    %c0_i32_0 = arith.constant 0 : i32
    %c0_i32_1 = arith.constant 0 : i32
    return %c0_i32, %c0_i32_0 : i32, i32
  }
  func.func @transform_7(%arg0: i32) -> (i32, i32) {
    %c0_i32 = arith.constant 0 : i32
    %c0_i32_0 = arith.constant 0 : i32
    %c0_i32_1 = arith.constant 0 : i32
    return %c0_i32, %c0_i32_0 : i32, i32
  }
  func.func @transform_8(%arg0: i32) -> (i32, i32) {
    %c0_i32 = arith.constant 0 : i32
    %c0_i32_0 = arith.constant 0 : i32
    %c0_i32_1 = arith.constant 0 : i32
    return %c0_i32, %c0_i32_0 : i32, i32
  }
  func.func @transform_9(%arg0: i32) -> (i32, i32) {
    %c0_i32 = arith.constant 0 : i32
    %c0_i32_0 = arith.constant 0 : i32
    %c0_i32_1 = arith.constant 0 : i32
    return %c0_i32, %c0_i32_0 : i32, i32
  }
  func.func @transform_10(%arg0: i32) -> (i32, i32) {
    %c0_i32 = arith.constant 0 : i32
    %c0_i32_0 = arith.constant 0 : i32
    %c0_i32_1 = arith.constant 0 : i32
    return %c0_i32, %c0_i32_0 : i32, i32
  }
  func.func @transform_11(%arg0: i32) -> (i32, i32) {
    %c0_i32 = arith.constant 0 : i32
    %c0_i32_0 = arith.constant 0 : i32
    return %arg0, %c0_i32 : i32, i32
  }
}

</mosaic_0001>

<bundles_post_ra>
// kernel: tpu_custom_call.1
= control target key start
LH: loop header
LB: loop body
LE: loop exit
PB: predicated region body
PF: predicated region fallthrough
CT: control target
= control target key end

     0   :  { %16 = vsyncpa [#allocation3], 0  ;;  %s1723_s0 = inlined_call_operand.hbm [shape: f32[8,784], index: 0, kind: input, shape index: {}]   ;;  %s1724_s1 = inlined_call_operand.hbm [shape: bf16[784,128], index: 1, kind: input, shape index: {}]   ;;  %s1725_s2 = inlined_call_operand.vmem [shape: f32[1,128], index: 2, kind: input, shape index: {}]   ;;  %s1726_s3 = inlined_call_operand.hbm [shape: bf16[128,128], index: 3, kind: input, shape index: {}]   ;;  %s1727_s4 = inlined_call_operand.vmem [shape: f32[1,128], index: 4, kind: input, shape index: {}]   ;;  %s1728_s5 = inlined_call_operand.hbm [shape: bf16[128,128], index: 5, kind: input, shape index: {}]   ;;  %s1729_s6 = inlined_call_operand.vmem [shape: f32[1,128], index: 6, kind: input, shape index: {}]   ;;  %s1730_s7 = inlined_call_operand.hbm [shape: bf16[128,128], index: 7, kind: input, shape index: {}]   ;;  %s1731_s8 = inlined_call_operand.vmem [shape: f32[1,128], index: 8, kind: input, shape index: {}]   ;;  %s1732_s9 = inlined_call_operand.hbm [shape: bf16[128,128], index: 9, kind: input, shape index: {}]   ;;  %s1733_s10 = inlined_call_operand.vmem [shape: f32[1,128], index: 10, kind: input, shape index: {}]   ;;  %s1734_s11 = inlined_call_operand.hbm [shape: bf16[8,128], index: 11, kind: output, shape index: {}]  }
   0x1   :  { %17 = vsyncpa [#allocation6], 0 }
   0x2   :  { %18 = vsyncpa [#allocation9], 0 }
   0x3   :  { %19 = vsyncpa [#allocation12], 0  ;;  %s36_s19 = sshll.u32 %s1724_s1, 4  ;;  %s37_s19 = int_to_ptr.hbm [resolvable:$true] %s36_s19 }
   0x4   :  { %20 = vsyncpa [#allocation4], 0  ;;  %s1603_s20 = smov [#allocation5]   ;;  %s66_s24 = sshll.u32 %s1728_s5, 4  ;;  %s67_s24 = int_to_ptr.hbm [resolvable:$true] %s66_s24 }
   0x5   :  { %s38_s21 = sshll.u32 %s1603_s20, 4  ;;  %s1604_s25 = smov 64   ;;  %s39_s21 = int_to_ptr.vmem [resolvable:$true] %s38_s21 }
   0x6   :  { %s1605_s26 = smov 4   ;;  %s1606_s27 = smov [#allocation8]  }
   0x7   :  { %44 = dma.hbm_to_vmem [thread:$0]  %s37_s19, 6272, %s39_s21, [#allocation6], %s1604_s25, %s1604_s25, %s1605_s26  }
   0x8   :  { %s68_s28 = sshll.u32 %s1606_s27, 4  ;;  %s26_s30 = sshll.u32 %s1723_s0, 4  ;;  %s69_s28 = int_to_ptr.vmem [resolvable:$true] %s68_s28  ;;  %s27_s30 = int_to_ptr.hbm [resolvable:$true] %s26_s30 }
   0x9   :  { %74 = dma.hbm_to_vmem [thread:$0]  %s67_s24, 1024, %s69_s28, [#allocation9], %s1604_s25, %s1604_s25, %s1605_s26  }
   0xa   :  { %s51_s13 = sshll.u32 %s1726_s3, 4  ;;  %s1607_s14 = smov [#allocation2]   ;;  %s52_s13 = int_to_ptr.hbm [resolvable:$true] %s51_s13 }
   0xb   :  { %s28_s15 = sshll.u32 %s1607_s14, 4  ;;  %s1608_s16 = smov [#allocation7]   ;;  %s29_s15 = int_to_ptr.vmem [resolvable:$true] %s28_s15 }
   0xc   :  { %31 = dma.hbm_to_vmem [thread:$0]  %s27_s30, 896, %s29_s15, [#allocation3]  }
   0xd   :  { %s53_s17 = sshll.u32 %s1608_s16, 4  ;;  %s81_s0 = sshll.u32 %s1730_s7, 4  ;;  %s54_s17 = int_to_ptr.vmem [resolvable:$true] %s53_s17  ;;  %s82_s0 = int_to_ptr.hbm [resolvable:$true] %s81_s0 }
   0xe   :  { %59 = dma.hbm_to_vmem [thread:$0]  %s52_s13, 1024, %s54_s17, [#allocation6], %s1604_s25, %s1604_s25, %s1605_s26  }
   0xf   :  { %s96_s3 = sshll.u32 %s1732_s9, 4  ;;  %s1609_s22 = smov [#allocation10]   ;;  %s97_s3 = int_to_ptr.hbm [resolvable:$true] %s96_s3 }
  0x10   :  { %s83_s23 = sshll.u32 %s1609_s22, 4  ;;  %s1610_s24 = smov [#allocation11]   ;;  %s84_s23 = int_to_ptr.vmem [resolvable:$true] %s83_s23 }
  0x11   :  { %89 = dma.hbm_to_vmem [thread:$0]  %s82_s0, 1024, %s84_s23, [#allocation9], %s1604_s25, %s1604_s25, %s1605_s26  }
  0x12   :  { %s98_s7 = sshll.u32 %s1610_s24, 4  ;;  %s99_s7 = int_to_ptr.vmem [resolvable:$true] %s98_s7 }
  0x13   :  { %104 = dma.hbm_to_vmem [thread:$0]  %s97_s3, 1024, %s99_s7, [#allocation12], %s1604_s25, %s1604_s25, %s1605_s26  }
  0x14   :  { %1593 = dma.done.wait [#allocation3], 896  }
  0x15   :  { %1594 = vsyncadd [#allocation3], 4294966400 }
  0x16   :  { %1595 = dma.done.wait [#allocation6], 7296  }
  0x17   :  { %1596 = vsyncadd [#allocation6], 4294960000 }
  0x18   :  { %1597 = dma.done.wait [#allocation9], 2048  }
  0x19   :  { %1598 = vsyncadd [#allocation9], 4294965248 }
  0x1a   :  { %1599 = dma.done.wait [#allocation12], 1024  }
  0x1b   :  { %1600 = vsyncadd [#allocation12], 4294966272  ;;  %v1333_v0 = vld [vmem:[#allocation5 + $0x38] sm:$0xff]  ;;  %v1332_v3 = vld [vmem:[#allocation5 + $0x30] sm:$0xff]  ;;  %vm542_vm0 = vcmask 130048  }
  0x1c   :  { %v1341_v1 = vld [vmem:[#allocation5 + $0x78] sm:$0xff]  ;;  %546 = vmatpush.bf16.msra.mxu0 %v1333_v0  ;;  %v1340_v4 = vld [vmem:[#allocation5 + $0x70] sm:$0xff]  ;;  %v1331_v8 = vld [vmem:[#allocation5 + $0x28] sm:$0xff] }
  0x1d   :  { %v1349_v2 = vld [vmem:[#allocation5 + $0xb8] sm:$0xff]  ;;  %559 = vmatpush.bf16.msra.mxu1 %v1341_v1  ;;  %v1348_v5 = vld [vmem:[#allocation5 + $0xb0] sm:$0xff]  ;;  %v1339_v9 = vld [vmem:[#allocation5 + $0x68] sm:$0xff] }
  0x1e   :  { %572 = vmatpush.bf16.msra.mxu2 %v1349_v2  ;;  %v1357_v6 = vld [vmem:[#allocation5 + $0xf8] sm:$0xff]  ;;  %v1356_v7 = vld [vmem:[#allocation5 + $0xf0] sm:$0xff]  ;;  %v1347_v10 = vld [vmem:[#allocation5 + $0xa8] sm:$0xff] }
  0x1f   :  { %585 = vmatpush.bf16.msra.mxu3 %v1357_v6  ;;  %v1355_v11 = vld [vmem:[#allocation5 + $0xe8] sm:$0xff]  ;;  %v1330_v12 = vld [vmem:[#allocation5 + $0x20] sm:$0xff]  ;;  %v1329_v16 = vld [vmem:[#allocation5 + $0x18] sm:$0xff] }
  0x20   :  { %547 = vmatpush.bf16.msra.mxu0 %v1332_v3  ;;  %v1338_v13 = vld [vmem:[#allocation5 + $0x60] sm:$0xff]  ;;  %v1337_v17 = vld [vmem:[#allocation5 + $0x58] sm:$0xff]  ;;  %v1328_v20 = vld [vmem:[#allocation5 + $0x10] sm:$0xff] }
  0x21   :  { %560 = vmatpush.bf16.msra.mxu1 %v1340_v4  ;;  %v1346_v14 = vld [vmem:[#allocation5 + $0xa0] sm:$0xff]  ;;  %v1345_v18 = vld [vmem:[#allocation5 + $0x98] sm:$0xff]  ;;  %v1336_v21 = vld [vmem:[#allocation5 + $0x50] sm:$0xff] }
  0x22   :  { %573 = vmatpush.bf16.msra.mxu2 %v1348_v5  ;;  %v1354_v15 = vld [vmem:[#allocation5 + $0xe0] sm:$0xff]  ;;  %v1353_v19 = vld [vmem:[#allocation5 + $0xd8] sm:$0xff]  ;;  %v1344_v22 = vld [vmem:[#allocation5 + $0x90] sm:$0xff] }
  0x23   :  { %586 = vmatpush.bf16.msra.mxu3 %v1356_v7  ;;  %v1352_v23 = vld [vmem:[#allocation5 + $0xd0] sm:$0xff]  ;;  %v1327_v24 = vld [vmem:[#allocation5 + $0x8] sm:$0xff]  ;;  %v1326_v27 = vld [vmem:[#allocation5] sm:$0xff] }
  0x24   :  { %548 = vmatpush.bf16.msra.mxu0 %v1331_v8  ;;  %v1335_v25 = vld [vmem:[#allocation5 + $0x48] sm:$0xff]  ;;  %v1334_v29 = vld [vmem:[#allocation5 + $0x40] sm:$0xff]  ;;  %v133_v31 = vld [vmem:[#allocation2 + $0x8] sm:$0xff] }
  0x25   :  { %561 = vmatpush.bf16.msra.mxu1 %v1339_v9  ;;  %v1343_v26 = vld [vmem:[#allocation5 + $0x88] sm:$0xff]  ;;  %v1365_v32 = vld [vmem:[#allocation5 + $0x138] sm:$0xff]  ;;  %v1342_v34 = vld [vmem:[#allocation5 + $0x80] sm:$0xff]  ;;  %v140_v37 = vpack.c.bf16 %v133_v31, %v133_v31 }
  0x26   :  { %574 = vmatpush.bf16.msra.mxu2 %v1347_v10  ;;  %v1351_v28 = vld [vmem:[#allocation5 + $0xc8] sm:$0xff]  ;;  %v1373_v33 = vld [vmem:[#allocation5 + $0x178] sm:$0xff]  ;;  %v1350_v38 = vld [vmem:[#allocation5 + $0xc0] sm:$0xff] }
  0x27   :  { %587 = vmatpush.bf16.msra.mxu3 %v1355_v11  ;;  %v132_v30 = vld [vmem:[#allocation2] sm:$0xff]  ;;  %v134_v35 = vld [vmem:[#allocation2 + $0x10] sm:$0xff]  ;;  %v1374_v39 = vld [vmem:[#allocation5 + $0x180] sm:$0xff] }
  0x28   :  { %549 = vmatpush.bf16.msra.mxu0 %v1330_v12  ;;  %v139_v36 = vpack.c.bf16 %v132_v30, %v132_v30  ;;  %v135_v40 = vld [vmem:[#allocation2 + $0x18] sm:$0xff]  ;;  %v1364_v41 = vld [vmem:[#allocation5 + $0x130] sm:$0xff]  ;;  %v141_v43 = vpack.c.bf16 %v134_v35, %v134_v35  ;;  %v1363_v45 = vld [vmem:[#allocation5 + $0x128] sm:$0xff] }
  0x29   :  { %562 = vmatpush.bf16.msra.mxu1 %v1338_v13  ;;  %v1372_v42 = vld [vmem:[#allocation5 + $0x170] sm:$0xff]  ;;  %v142_v44 = vpack.c.bf16 %v135_v40, %v135_v40  ;;  %v1371_v46 = vld [vmem:[#allocation5 + $0x168] sm:$0xff]  ;;  %v1362_v47 = vld [vmem:[#allocation5 + $0x120] sm:$0xff] }
  0x2a   :  { %575 = vmatpush.bf16.msra.mxu2 %v1346_v14  ;;  %v1370_v48 = vld [vmem:[#allocation5 + $0x160] sm:$0xff]  ;;  %v1361_v49 = vld [vmem:[#allocation5 + $0x118] sm:$0xff]  ;;  %v1360_v52 = vld [vmem:[#allocation5 + $0x110] sm:$0xff] }
  0x2b   :  { %588 = vmatpush.bf16.msra.mxu3 %v1354_v15  ;;  %v1369_v50 = vld [vmem:[#allocation5 + $0x158] sm:$0xff]  ;;  %v1368_v53 = vld [vmem:[#allocation5 + $0x150] sm:$0xff]  ;;  %v1359_v55 = vld [vmem:[#allocation5 + $0x108] sm:$0xff] }
  0x2c   :  { %550 = vmatpush.bf16.msra.mxu0 %v1329_v16  ;;  %v138_v51 = vld [vmem:[#allocation2 + $0x30] sm:$0xff]  ;;  %v1367_v56 = vld [vmem:[#allocation5 + $0x148] sm:$0xff]  ;;  %v1358_v57 = vld [vmem:[#allocation5 + $0x100] sm:$0xff] }
  0x2d   :  { %563 = vmatpush.bf16.msra.mxu1 %v1337_v17  ;;  %v145_v54 = vpack.c.bf16 %v138_v51, %v138_v51  ;;  %v1366_v58 = vld [vmem:[#allocation5 + $0x140] sm:$0xff]  ;;  %v136_v59 = vld [vmem:[#allocation2 + $0x20] sm:$0xff]  ;;  %v137_v60 = vld [vmem:[#allocation2 + $0x28] sm:$0xff] }
  0x2e   :  { %576 = vmatpush.bf16.msra.mxu2 %v1345_v18  ;;  %v143_v61 = vpack.c.bf16 %v136_v59, %v136_v59  ;;  %v144_v62 = vpack.c.bf16 %v137_v60, %v137_v60  ;;  %v1382_v63 = vld [vmem:[#allocation7 + $0x38] sm:$0xff]  ;;  %v1381_v0 = vld [vmem:[#allocation7 + $0x30] sm:$0xff]  ;;  %v1380_v1 = vld [vmem:[#allocation7 + $0x28] sm:$0xff] }
  0x2f   :  { %589 = vmatpush.bf16.msra.mxu3 %v1353_v19  ;;  %v1379_v2 = vld [vmem:[#allocation7 + $0x20] sm:$0xff]  ;;  %v1378_v3 = vld [vmem:[#allocation7 + $0x18] sm:$0xff]  ;;  %v1377_v4 = vld [vmem:[#allocation7 + $0x10] sm:$0xff] }
  0x30   :  { %551 = vmatpush.bf16.msra.mxu0 %v1328_v20  ;;  %v1376_v5 = vld [vmem:[#allocation7 + $0x8] sm:$0xff]  ;;  %v1375_v8 = vld [vmem:[#allocation7] sm:$0xff]  ;;  %v1390_v11 = vld [vmem:[#allocation8 + $0x38] sm:$0xff] }
  0x31   :  { %564 = vmatpush.bf16.msra.mxu1 %v1336_v21  ;;  %v1389_v14 = vld [vmem:[#allocation8 + $0x30] sm:$0xff]  ;;  %v1416_v15 = vld [vmem:[%s1725_s2] ss:$0 sm:$0xff]  ;;  %v1388_v16 = vld [vmem:[#allocation8 + $0x28] sm:$0xff] }
  0x32   :  { %577 = vmatpush.bf16.msra.mxu2 %v1344_v22  ;;  %v1387_v20 = vld [vmem:[#allocation8 + $0x20] sm:$0xff]  ;;  %v1386_v22 = vld [vmem:[#allocation8 + $0x18] sm:$0xff]  ;;  %v1397_v40 = vld [vmem:[#allocation10 + $0x30] sm:$0xff] }
  0x33   :  { %590 = vmatpush.bf16.msra.mxu3 %v1352_v23  ;;  %v1392_v51 = vld [vmem:[#allocation10 + $0x8] sm:$0xff]  ;;  %v1418_v59 = vld [vmem:[%s1729_s6] ss:$0 sm:$0xff] }
  0x34   :  { %552 = vmatpush.bf16.msra.mxu0 %v1327_v24 }
  0x35   :  { %565 = vmatpush.bf16.msra.mxu1 %v1335_v25  ;;  %v1385_v25 = vld [vmem:[#allocation8 + $0x10] sm:$0xff] }
  0x36   :  { %578 = vmatpush.bf16.msra.mxu2 %v1343_v26 }
  0x37   :  { %591 = vmatpush.bf16.msra.mxu3 %v1351_v28 }
  0x38   :  { %553 = vmatpush.bf16.msra.mxu0 %v1326_v27 }
  0x39   :  { %566 = vmatpush.bf16.msra.mxu1 %v1334_v29 }
  0x3a   :  { %579 = vmatpush.bf16.msra.mxu2 %v1342_v34 }
  0x3b   :  { %554 = vmatmul.bf16.vlgmr.msra.gmra.mxu0 %v139_v36  ;;  %592 = vmatpush.bf16.msra.mxu3 %v1350_v38  ;;  %v1383_v38 = vld [vmem:[#allocation8] sm:$0xff] }
  0x3c   :  { %598 = vmatpush.bf16.msrb.mxu0 %v1365_v32  ;;  %567 = vmatmul.bf16.vlgmr.msra.gmra.mxu1 %v140_v37  ;;  %v1384_v37 = vld [vmem:[#allocation8 + $0x8] sm:$0xff] }
  0x3d   :  { %611 = vmatpush.bf16.msrb.mxu1 %v1373_v33  ;;  %580 = vmatmul.bf16.vlgmr.msra.gmra.mxu2 %v141_v43  ;;  %v1394_v43 = vld [vmem:[#allocation10 + $0x18] sm:$0xff] }
  0x3e   :  { %631 = vmatpush.bf16.msrb.mxu2 %v1374_v39  ;;  %593 = vmatmul.bf16.vlgmr.msra.gmra.mxu3 %v142_v44  ;;  %v1398_v39 = vld [vmem:[#allocation10 + $0x38] sm:$0xff]  ;;  %v1393_v44 = vld [vmem:[#allocation10 + $0x10] sm:$0xff] }
  0x3f   :  { %707 = vmatpush.bf16.msrb.mxu3 %v1382_v63 }
  0x40   :  { %599 = vmatpush.bf16.msrb.mxu0 %v1364_v41  ;;  %v1396_v41 = vld [vmem:[#allocation10 + $0x28] sm:$0xff] }
  0x41   :  { %612 = vmatpush.bf16.msrb.mxu1 %v1372_v42  ;;  %v1395_v42 = vld [vmem:[#allocation10 + $0x20] sm:$0xff] }
  0x42   :  { %790 = vmatpush.bf16.msra.mxu2 %v1390_v11 }
  0x43   :  { %708 = vmatpush.bf16.msrb.mxu3 %v1381_v0 }
  0x44   :  { %600 = vmatpush.bf16.msrb.mxu0 %v1363_v45  ;;  %v1417_v45 = vld [vmem:[%s1727_s4] ss:$0 sm:$0xff] }
  0x45   :  { %613 = vmatpush.bf16.msrb.mxu1 %v1371_v46 }
  0x46   :  { %791 = vmatpush.bf16.msra.mxu2 %v1389_v14 }
  0x47   :  { %709 = vmatpush.bf16.msrb.mxu3 %v1380_v1  ;;  %v1400_v1 = vld [vmem:[#allocation11 + $0x8] sm:$0xff] }
  0x48   :  { %601 = vmatpush.bf16.msrb.mxu0 %v1362_v47 }
  0x49   :  { %614 = vmatpush.bf16.msrb.mxu1 %v1370_v48 }
  0x4a   :  { %792 = vmatpush.bf16.msra.mxu2 %v1388_v16 }
  0x4b   :  { %710 = vmatpush.bf16.msrb.mxu3 %v1379_v2  ;;  %v1399_v2 = vld [vmem:[#allocation11] sm:$0xff] }
  0x4c   :  { %602 = vmatpush.bf16.msrb.mxu0 %v1361_v49 }
  0x4d   :  { %615 = vmatpush.bf16.msrb.mxu1 %v1369_v50  ;;  %1197 = vmatmul.msk.bf16.vlgmr.msrb.gmra.mxu2 %vm542_vm0, %v145_v54  ;;  %v1405_v54 = vld [vmem:[#allocation11 + $0x30] sm:$0xff] }
  0x4e   :  { %793 = vmatpush.bf16.msra.mxu2 %v1387_v20 }
  0x4f   :  { %711 = vmatpush.bf16.msrb.mxu3 %v1378_v3  ;;  %v1419_v3 = vld [vmem:[%s1731_s8] ss:$0 sm:$0xff]  ;;  %s1611_s8 = smov [#allocation13]  }
  0x50   :  { %603 = vmatpush.bf16.msrb.mxu0 %v1360_v52  ;;  %v1391_v52 = vld [vmem:[#allocation10] sm:$0xff]  ;;  %s986_s30 = sshll.u32 %s1611_s8, 4  ;;  %s987_s30 = int_to_ptr.vmem [resolvable:$true] %s986_s30 }
  0x51   :  { %616 = vmatpush.bf16.msrb.mxu1 %v1368_v53  ;;  %v1406_v53 = vld [vmem:[#allocation11 + $0x38] sm:$0xff] }
  0x52   :  { %794 = vmatpush.bf16.msra.mxu2 %v1386_v22 }
  0x53   :  { %712 = vmatpush.bf16.msrb.mxu3 %v1377_v4 }
  0x54   :  { %604 = vmatpush.bf16.msrb.mxu0 %v1359_v55  ;;  %v1404_v55 = vld [vmem:[#allocation11 + $0x28] sm:$0xff] }
  0x55   :  { %617 = vmatpush.bf16.msrb.mxu1 %v1367_v56  ;;  %v1403_v56 = vld [vmem:[#allocation11 + $0x20] sm:$0xff] }
  0x56   :  { %795 = vmatpush.bf16.msra.mxu2 %v1385_v25 }
  0x57   :  { %713 = vmatpush.bf16.msrb.mxu3 %v1376_v5 }
  0x58   :  { %605 = vmatpush.bf16.msrb.mxu0 %v1358_v57  ;;  %v1402_v57 = vld [vmem:[#allocation11 + $0x18] sm:$0xff] }
  0x59   :  { %618 = vmatpush.bf16.msrb.mxu1 %v1366_v58  ;;  %v1401_v58 = vld [vmem:[#allocation11 + $0x10] sm:$0xff] }
  0x5a   :  { %796 = vmatpush.bf16.msra.mxu2 %v1384_v37 }
  0x5b   :  { %606 = vmatmul.bf16.vlgmr.msrb.gmra.mxu0 %v143_v61  ;;  %714 = vmatpush.bf16.msrb.mxu3 %v1375_v8 }
  0x5c   :  { %619 = vmatmul.bf16.vlgmr.msrb.gmra.mxu1 %v144_v62  ;;  %873 = vmatpush.bf16.msra.mxu0 %v1398_v39 }
  0x5d   :  { %956 = vmatpush.bf16.msra.mxu1 %v1406_v53 }
  0x5e   :  { %797 = vmatpush.bf16.msra.mxu2 %v1383_v38 }
  0x60   :  { %874 = vmatpush.bf16.msra.mxu0 %v1397_v40 }
  0x61   :  { %957 = vmatpush.bf16.msra.mxu1 %v1405_v54 }
  0x64   :  { %875 = vmatpush.bf16.msra.mxu0 %v1396_v41 }
  0x65   :  { %958 = vmatpush.bf16.msra.mxu1 %v1404_v55 }
  0x68   :  { %876 = vmatpush.bf16.msra.mxu0 %v1395_v42 }
  0x69   :  { %959 = vmatpush.bf16.msra.mxu1 %v1403_v56 }
  0x6c   :  { %877 = vmatpush.bf16.msra.mxu0 %v1394_v43 }
  0x6d   :  { %960 = vmatpush.bf16.msra.mxu1 %v1402_v57 }
  0x70   :  { %878 = vmatpush.bf16.msra.mxu0 %v1393_v44 }
  0x71   :  { %961 = vmatpush.bf16.msra.mxu1 %v1401_v58 }
  0x74   :  { %879 = vmatpush.bf16.msra.mxu0 %v1392_v51 }
  0x75   :  { %962 = vmatpush.bf16.msra.mxu1 %v1400_v1 }
  0x78   :  { %880 = vmatpush.bf16.msra.mxu0 %v1391_v52 }
  0x79   :  { %963 = vmatpush.bf16.msra.mxu1 %v1399_v2 }
  0xb8   :  { %v555_v6 = vpop.f32.mrf.mxu0 }
  0xb9   :  { %v568_v7 = vpop.f32.mrf.mxu1  ;;  %v556_v17 = vadd.f32 %v1416_v15, %v555_v6 }
  0xbb   :  { %v569_v21 = vadd.f32 %v568_v7, %v556_v17 }
  0xc0   :  { %v557_v9 = vpop.f32.mrf.mxu0  ;;  %v581_v12 = vpop.f32.mrf.mxu2 }
  0xc1   :  { %v570_v10 = vpop.f32.mrf.mxu1  ;;  %v594_v13 = vpop.f32.mrf.mxu3  ;;  %v582_v23 = vadd.f32 %v581_v12, %v569_v21  ;;  %v1420_v9 = vld [vmem:[%s1733_s10] ss:$0 sm:$0xff]  ;;  %s988_s10 = sshll.u32 %s1734_s11, 4  ;;  %s989_s10 = int_to_ptr.hbm [resolvable:$true] %s988_s10 }
  0xc3   :  { %v595_v26 = vadd.f32 %v594_v13, %v582_v23 }
  0xc8   :  { %v583_v18 = vpop.f32.mrf.mxu2 }
  0xc9   :  { %v596_v19 = vpop.f32.mrf.mxu3 }
  0xd0   :  { %v633_v24 = vpop.f32.mrf.mxu2 }
  0xd8   :  { %v607_v27 = vpop.f32.mrf.mxu0  ;;  %v635_v31 = vpop.f32.mrf.mxu2 }
  0xd9   :  { %v620_v28 = vpop.f32.mrf.mxu1  ;;  %v608_v29 = vadd.f32 %v607_v27, %v595_v26 }
  0xdb   :  { %v621_v30 = vadd.f32 %v620_v28, %v608_v29 }
  0xdd   :  { %v634_v32 = vadd.f32 %v633_v24, %v621_v30 }
  0xdf   :  { %v637_v33 = vmax.f32 %v634_v32, 0.0 }
  0xe0   :  { %v609_v34 = vpop.f32.mrf.mxu0 }
  0xe1   :  { %v622_v35 = vpop.f32.mrf.mxu1  ;;  %v638_v36 = vpack.c.bf16 %v637_v33, %v637_v33 }
  0xe3   :  { %715 = vmatmul.bf16.vlgmr.msrb.gmra.mxu3 %v638_v36 }
 0x166   :  { %v716_v46 = vpop.f32.mrf.mxu3 }
 0x167   :  { %v717_v47 = vadd.f32 %v1417_v45, %v716_v46 }
 0x169   :  { %v720_v48 = vmax.f32 %v717_v47, 0.0 }
 0x16b   :  { %v721_v49 = vpack.c.bf16 %v720_v48, %v720_v48 }
 0x16d   :  { %798 = vmatmul.bf16.vlgmr.msra.gmra.mxu2 %v721_v49 }
 0x16e   :  { %v718_v50 = vpop.f32.mrf.mxu3 }
 0x1f0   :  { %v799_v60 = vpop.f32.mrf.mxu2 }
 0x1f1   :  { %v800_v61 = vadd.f32 %v1418_v59, %v799_v60 }
 0x1f3   :  { %v803_v62 = vmax.f32 %v800_v61, 0.0 }
 0x1f5   :  { %v804_v63 = vpack.c.bf16 %v803_v62, %v803_v62 }
 0x1f7   :  { %881 = vmatmul.bf16.vlgmr.msra.gmra.mxu0 %v804_v63 }
 0x1f8   :  { %v801_v0 = vpop.f32.mrf.mxu2 }
 0x274   :  { %v882_v4 = vpop.f32.mrf.mxu0 }
 0x275   :  { %v883_v5 = vadd.f32 %v1419_v3, %v882_v4 }
 0x277   :  { %v886_v6 = vmax.f32 %v883_v5, 0.0 }
 0x279   :  { %v887_v7 = vpack.c.bf16 %v886_v6, %v886_v6 }
 0x27b   :  { %964 = vmatmul.bf16.vlgmr.msra.gmra.mxu1 %v887_v7 }
 0x27c   :  { %v884_v8 = vpop.f32.mrf.mxu0 }
 0x2f8   :  { %v965_v10 = vpop.f32.mrf.mxu1 }
 0x2f9   :  { %v966_v11 = vadd.f32 %v1420_v9, %v965_v10 }
 0x2fb   :  { %969 = vmax.xlane.f32.xlu0 %v966_v11 }
 0x300   :  { %v967_v12 = vpop.f32.mrf.mxu1 }
 0x36e   :  { %v970_v13 = vpop.xlane.xlu0 %969 }
 0x36f   :  { %v971_v14 = vsub.f32 %v966_v11, %v970_v13 }
 0x371   :  { %v972_v15 = vmul.f32 1.442695, %v971_v14 }
 0x373   :  { %1421 = vpow2.f32 %v972_v15 }
 0x379   :  { %v1422_v16 = vpop.eup %1421 }
 0x37a   :  { %974 = vadd.xlane.f32.xlu0 %v1422_v16 }
 0x3ed   :  { %v975_v17 = vpop.xlane.xlu0 %974 }
 0x3ee   :  { %1423 = vlog2.f32 %v975_v17 }
 0x3f4   :  { %v1424_v18 = vpop.eup %1423 }
 0x3f5   :  { %v977_v19 = vmul.f32 0.6931472, %v1424_v18 }
 0x3f7   :  { %v978_v20 = vsub.f32 %v971_v14, %v977_v19 }
 0x3f9   :  { %v979_v21 = vpack.c.bf16 %v978_v20, %v978_v20 }
 0x3fb   :  { %980 = vst [vmem:[#allocation13] sm:$0xf] %v979_v21 }
 0x3fc   :  { %991 = dma.vmem_to_hbm [thread:$0]  %s987_s30, 64, %s989_s10, [#allocation4]  }
 0x3fd   :  { %1601 = dma.done.wait [#allocation4], 64  }
 0x3fe   :  { %1602 = vsyncadd [#allocation4], 4294967232 }
 0x3ff   :  { %996 = vsyncpa [#allocation3], 1 }
 0x400   :  { %997 = vsyncpa [#allocation6], 1 }
 0x401   :  { %998 = vsyncpa [#allocation9], 1 }
 0x402   :  { %999 = vsyncpa [#allocation12], 1 }
 0x403   :  { %1000 = vsyncpa [#allocation4], 1 }

</bundles_post_ra>
